<compile_context>
chip_gen: v5e
topology: v5e:2x2
jax: 0.10.0
libtpu: 0.0.40
codegen_flags: <defaults>
</compile_context>

<pallas_src>
import jax
import jax.numpy as jnp
from jax.experimental import pallas as pl
from jax.experimental.pallas import tpu as pltpu

NUM_HEADS = 3            # early, middle, deep
_DEFAULT_MAX_CHUNK = 8192  # lanes per grid step; shrink for v7x / large C if needed


def _attention_scores_kernel(x_ref, w_ref, b_ref, out_ref,
                             scores_ref, m_ref, l_ref):
    """One (batch, spatial-chunk) grid step.

    x_ref      : (1, C, s_chunk)  features, NCHW-native, spatial on lanes
    w_ref      : (NUM_HEADS, C)   SMEM 1x1-conv weights (scalar reads)
    b_ref      : (NUM_HEADS,)     SMEM per-head bias
    out_ref    : (1, NUM_HEADS, num_chunks, s_chunk)  resident across chunk axis
    scores_ref : (num_chunks, NUM_HEADS, s_chunk)     VMEM raw-score stash
    m_ref,l_ref: (NUM_HEADS, 1)   online-softmax running max / rescaled sum
    """
    k = pl.program_id(1)
    num_chunks = scores_ref.shape[0]
    C = x_ref.shape[1]
    s_chunk = x_ref.shape[2]

    # ---- 1x1 conv (C -> 3 heads) as unrolled VPU broadcast-FMA (no MXU) ----
    accs = [jnp.full((1, s_chunk), b_ref[h], dtype=jnp.float32)
            for h in range(NUM_HEADS)]
    for c in range(C):                                  # static unroll over channels
        xc = x_ref[0, c:c + 1, :].astype(jnp.float32)   # (1, s_chunk), lane-dense
        for h in range(NUM_HEADS):
            accs[h] = accs[h] + w_ref[h, c] * xc
    s = jnp.concatenate(accs, axis=0)                   # (NUM_HEADS, s_chunk)

    # Stash raw scores; dynamic index only on the leading (untiled) dim.
    scores_ref[k] = s

    # ---- online softmax statistics across spatial chunks ----
    @pl.when(k == 0)
    def _():
        m_ref[...] = jnp.full_like(m_ref, -jnp.inf)
        l_ref[...] = jnp.zeros_like(l_ref)

    m_old = m_ref[...]                                               # (3, 1)
    m_new = jnp.maximum(m_old, jnp.max(s, axis=-1, keepdims=True))   # (3, 1)
    l_ref[...] = (l_ref[...] * jnp.exp(m_old - m_new)
                  + jnp.sum(jnp.exp(s - m_new), axis=-1, keepdims=True))
    m_ref[...] = m_new

    # ---- finalize on the last chunk: normalize + one lane-dense output write ----
    @pl.when(k == pl.num_programs(1) - 1)
    def _():
        m_fin = m_ref[...]
        inv_l = pl.reciprocal(l_ref[...], approx=False)  # exact: keep 1e-5 tolerance
        for j in range(num_chunks):                      # static unroll, static indices
            out_ref[0, :, j, :] = jnp.exp(scores_ref[j] - m_fin) * inv_l


def _pick_s_chunk(S, max_chunk=_DEFAULT_MAX_CHUNK):
    """Largest 128-multiple divisor of S not exceeding max_chunk (or S itself)."""
    if S <= max_chunk:
        return S
    cand = (max_chunk // 128) * 128
    while cand >= 128:
        if S % cand == 0:
            return cand
        cand -= 128
    # TODO(synk): S has no 128-multiple divisor <= max_chunk; fall back to one
    # whole-row block (may exceed VMEM for extreme spatial sizes).
    return S


def detection_module_forward(x_nchw, w, b, *, s_chunk=None):
    """Returns (early, middle, deep) attention maps, each [B, 1, H, W]."""
    B, C, H, W = x_nchw.shape
    S = H * W
    # NCHW is already channel-major: (B, C, S) is a free reshape (no transpose),
    # and keeps the input dtype for the HBM->VMEM DMA.
    x_bcs = x_nchw.reshape(B, C, S)

    if s_chunk is None:
        s_chunk = _pick_s_chunk(S)
    assert S % s_chunk == 0 and (s_chunk == S or s_chunk % 128 == 0)
    num_chunks = S // s_chunk

    w32 = w.astype(jnp.float32).reshape(NUM_HEADS, C)
    b32 = b.astype(jnp.float32).reshape(NUM_HEADS)

    grid_spec = pltpu.PrefetchScalarGridSpec(
        num_scalar_prefetch=0,
        grid=(B, num_chunks),
        in_specs=[
            pl.BlockSpec((1, C, s_chunk), lambda i, k: (i, 0, k)),     # features
            pl.BlockSpec(memory_space=pltpu.MemorySpace.SMEM),          # weights
            pl.BlockSpec(memory_space=pltpu.MemorySpace.SMEM),          # biases
        ],
        out_specs=pl.BlockSpec((1, NUM_HEADS, num_chunks, s_chunk),
                               lambda i, k: (i, 0, 0, 0)),
        scratch_shapes=[
            pltpu.VMEM((num_chunks, NUM_HEADS, s_chunk), jnp.float32),  # raw scores
            pltpu.VMEM((NUM_HEADS, 1), jnp.float32),                    # running max
            pltpu.VMEM((NUM_HEADS, 1), jnp.float32),                    # running sum
        ],
    )

    probs = pl.pallas_call(
        _attention_scores_kernel,
        out_shape=jax.ShapeDtypeStruct((B, NUM_HEADS, num_chunks, s_chunk),
                                       jnp.float32),
        grid_spec=grid_spec,
        compiler_params=pltpu.CompilerParams(
            dimension_semantics=("parallel", "arbitrary")),
    )(x_bcs, w32, b32)

    # (B, 3, num_chunks, s_chunk) -> (B, 3, H, W) is a free contiguous reshape;
    # per-head maps are cheap slices split in the wrapper.
    maps = probs.reshape(B, NUM_HEADS, H, W)
    return maps[:, 0:1], maps[:, 1:2], maps[:, 2:3]


def _reference_forward(x_nchw, w, b):
    """Pure-JAX reference for correctness checking."""
    B, C, H, W = x_nchw.shape
    S = H * W
    x = jnp.transpose(x_nchw, (0, 2, 3, 1)).reshape(B, S, C)
    s = jnp.einsum('bsc,hc->bhs', x, w) + b.reshape(1, NUM_HEADS, 1)
    probs = jax.nn.softmax(s, axis=-1)
    maps = probs.reshape(B, NUM_HEADS, H, W)
    return maps[:, 0:1], maps[:, 1:2], maps[:, 2:3]


if __name__ == "__main__":
    B, C, H, W = 2, 4, 16, 16

    key = jax.random.PRNGKey(0)
    kx, kw, kb = jax.random.split(key, 3)
    x = jax.random.normal(kx, (B, C, H, W), dtype=jnp.float32)
    # Deterministic synthetic parameters for the 3 attention heads (1x1 convs)
    w = jax.random.normal(kw, (NUM_HEADS, C), dtype=jnp.float32) * 0.1
    b = jax.random.normal(kb, (NUM_HEADS,), dtype=jnp.float32) * 0.01

    r_early, r_middle, r_deep = _reference_forward(x, w, b)

    # Default path: single spatial chunk at this small size.
    early, middle, deep = detection_module_forward(x, w, b)
    jax.block_until_ready((early, middle, deep))
    assert early.shape == (B, 1, H, W)
    assert middle.shape == (B, 1, H, W)
    assert deep.shape == (B, 1, H, W)
    assert jnp.allclose(early, r_early, atol=1e-5, rtol=1e-5)
    assert jnp.allclose(middle, r_middle, atol=1e-5, rtol=1e-5)
    assert jnp.allclose(deep, r_deep, atol=1e-5, rtol=1e-5)

    # Forced spatial tiling (2 chunks of 128): exercises the online-softmax path.
    e2, m2, d2 = detection_module_forward(x, w, b, s_chunk=128)
    jax.block_until_ready((e2, m2, d2))
    assert jnp.allclose(e2, r_early, atol=1e-5, rtol=1e-5)
    assert jnp.allclose(m2, r_middle, atol=1e-5, rtol=1e-5)
    assert jnp.allclose(d2, r_deep, atol=1e-5, rtol=1e-5)

    print("KERNEL_OK")
</pallas_src>

<mosaic_0001>
module attributes {stable_mosaic.version = 11 : i64} {
  func.func @_attention_scores_kernel(%arg0: i32, %arg1: i32, %arg2: memref<1x4x256xf32, #tpu.memory_space<vmem>>, %arg3: memref<3x4xf32, #tpu.memory_space<smem>>, %arg4: memref<3xf32, #tpu.memory_space<smem>>, %arg5: memref<1x3x1x256xf32, #tpu.memory_space<vmem>>, %arg6: memref<1x3x256xf32, #tpu.memory_space<vmem>>, %arg7: memref<3x1xf32, #tpu.memory_space<vmem>>, %arg8: memref<3x1xf32, #tpu.memory_space<vmem>>) attributes {dimension_semantics = [#tpu.dimension_semantics<parallel>, #tpu.dimension_semantics<arbitrary>], iteration_bounds = array<i64: 2, 1>, scalar_prefetch = 0 : i64, scratch_operands = 3 : i64, tpu.core_type = #tpu.core_type<tc>, window_params = [{transform_indices = @transform_0, window_bounds = array<i64: 1, 4, 256>}, {transform_indices = @transform_1, window_bounds = array<i64: 3, 4>}, {transform_indices = @transform_2, window_bounds = array<i64: 3>}, {transform_indices = @transform_3, window_bounds = array<i64: 1, 3, 1, 256>}]} {
    %c0 = arith.constant 0 : index
    %0 = memref.load %arg4[%c0] : memref<3xf32, #tpu.memory_space<smem>>
    %1 = vector.broadcast %0 : f32 to vector<1x256xf32>
    %c1 = arith.constant 1 : index
    %2 = memref.load %arg4[%c1] : memref<3xf32, #tpu.memory_space<smem>>
    %3 = vector.broadcast %2 : f32 to vector<1x256xf32>
    %c2 = arith.constant 2 : index
    %4 = memref.load %arg4[%c2] : memref<3xf32, #tpu.memory_space<smem>>
    %5 = vector.broadcast %4 : f32 to vector<1x256xf32>
    %c0_0 = arith.constant 0 : index
    %c0_1 = arith.constant 0 : index
    %c0_2 = arith.constant 0 : index
    %6 = vector.load %arg2[%c0_0, %c0_1, %c0_2] : memref<1x4x256xf32, #tpu.memory_space<vmem>>, vector<1x1x256xf32>
    %7 = vector.shape_cast %6 : vector<1x1x256xf32> to vector<1x256xf32>
    %c0_3 = arith.constant 0 : index
    %c0_4 = arith.constant 0 : index
    %8 = memref.load %arg3[%c0_3, %c0_4] : memref<3x4xf32, #tpu.memory_space<smem>>
    %9 = vector.broadcast %8 : f32 to vector<1x256xf32>
    %10 = arith.mulf %9, %7 : vector<1x256xf32>
    %11 = arith.addf %1, %10 : vector<1x256xf32>
    %c1_5 = arith.constant 1 : index
    %c0_6 = arith.constant 0 : index
    %12 = memref.load %arg3[%c1_5, %c0_6] : memref<3x4xf32, #tpu.memory_space<smem>>
    %13 = vector.broadcast %12 : f32 to vector<1x256xf32>
    %14 = arith.mulf %13, %7 : vector<1x256xf32>
    %15 = arith.addf %3, %14 : vector<1x256xf32>
    %c2_7 = arith.constant 2 : index
    %c0_8 = arith.constant 0 : index
    %16 = memref.load %arg3[%c2_7, %c0_8] : memref<3x4xf32, #tpu.memory_space<smem>>
    %17 = vector.broadcast %16 : f32 to vector<1x256xf32>
    %18 = arith.mulf %17, %7 : vector<1x256xf32>
    %19 = arith.addf %5, %18 : vector<1x256xf32>
    %c0_9 = arith.constant 0 : index
    %c1_10 = arith.constant 1 : index
    %c0_11 = arith.constant 0 : index
    %20 = vector.load %arg2[%c0_9, %c1_10, %c0_11] : memref<1x4x256xf32, #tpu.memory_space<vmem>>, vector<1x1x256xf32>
    %21 = vector.shape_cast %20 : vector<1x1x256xf32> to vector<1x256xf32>
    %c0_12 = arith.constant 0 : index
    %c1_13 = arith.constant 1 : index
    %22 = memref.load %arg3[%c0_12, %c1_13] : memref<3x4xf32, #tpu.memory_space<smem>>
    %23 = vector.broadcast %22 : f32 to vector<1x256xf32>
    %24 = arith.mulf %23, %21 : vector<1x256xf32>
    %25 = arith.addf %11, %24 : vector<1x256xf32>
    %c1_14 = arith.constant 1 : index
    %c1_15 = arith.constant 1 : index
    %26 = memref.load %arg3[%c1_14, %c1_15] : memref<3x4xf32, #tpu.memory_space<smem>>
    %27 = vector.broadcast %26 : f32 to vector<1x256xf32>
    %28 = arith.mulf %27, %21 : vector<1x256xf32>
    %29 = arith.addf %15, %28 : vector<1x256xf32>
    %c2_16 = arith.constant 2 : index
    %c1_17 = arith.constant 1 : index
    %30 = memref.load %arg3[%c2_16, %c1_17] : memref<3x4xf32, #tpu.memory_space<smem>>
    %31 = vector.broadcast %30 : f32 to vector<1x256xf32>
    %32 = arith.mulf %31, %21 : vector<1x256xf32>
    %33 = arith.addf %19, %32 : vector<1x256xf32>
    %c0_18 = arith.constant 0 : index
    %c2_19 = arith.constant 2 : index
    %c0_20 = arith.constant 0 : index
    %34 = vector.load %arg2[%c0_18, %c2_19, %c0_20] : memref<1x4x256xf32, #tpu.memory_space<vmem>>, vector<1x1x256xf32>
    %35 = vector.shape_cast %34 : vector<1x1x256xf32> to vector<1x256xf32>
    %c0_21 = arith.constant 0 : index
    %c2_22 = arith.constant 2 : index
    %36 = memref.load %arg3[%c0_21, %c2_22] : memref<3x4xf32, #tpu.memory_space<smem>>
    %37 = vector.broadcast %36 : f32 to vector<1x256xf32>
    %38 = arith.mulf %37, %35 : vector<1x256xf32>
    %39 = arith.addf %25, %38 : vector<1x256xf32>
    %c1_23 = arith.constant 1 : index
    %c2_24 = arith.constant 2 : index
    %40 = memref.load %arg3[%c1_23, %c2_24] : memref<3x4xf32, #tpu.memory_space<smem>>
    %41 = vector.broadcast %40 : f32 to vector<1x256xf32>
    %42 = arith.mulf %41, %35 : vector<1x256xf32>
    %43 = arith.addf %29, %42 : vector<1x256xf32>
    %c2_25 = arith.constant 2 : index
    %c2_26 = arith.constant 2 : index
    %44 = memref.load %arg3[%c2_25, %c2_26] : memref<3x4xf32, #tpu.memory_space<smem>>
    %45 = vector.broadcast %44 : f32 to vector<1x256xf32>
    %46 = arith.mulf %45, %35 : vector<1x256xf32>
    %47 = arith.addf %33, %46 : vector<1x256xf32>
    %c0_27 = arith.constant 0 : index
    %c3 = arith.constant 3 : index
    %c0_28 = arith.constant 0 : index
    %48 = vector.load %arg2[%c0_27, %c3, %c0_28] : memref<1x4x256xf32, #tpu.memory_space<vmem>>, vector<1x1x256xf32>
    %49 = vector.shape_cast %48 : vector<1x1x256xf32> to vector<1x256xf32>
    %c0_29 = arith.constant 0 : index
    %c3_30 = arith.constant 3 : index
    %50 = memref.load %arg3[%c0_29, %c3_30] : memref<3x4xf32, #tpu.memory_space<smem>>
    %51 = vector.broadcast %50 : f32 to vector<1x256xf32>
    %52 = arith.mulf %51, %49 : vector<1x256xf32>
    %53 = arith.addf %39, %52 : vector<1x256xf32>
    %c1_31 = arith.constant 1 : index
    %c3_32 = arith.constant 3 : index
    %54 = memref.load %arg3[%c1_31, %c3_32] : memref<3x4xf32, #tpu.memory_space<smem>>
    %55 = vector.broadcast %54 : f32 to vector<1x256xf32>
    %56 = arith.mulf %55, %49 : vector<1x256xf32>
    %57 = arith.addf %43, %56 : vector<1x256xf32>
    %c2_33 = arith.constant 2 : index
    %c3_34 = arith.constant 3 : index
    %58 = memref.load %arg3[%c2_33, %c3_34] : memref<3x4xf32, #tpu.memory_space<smem>>
    %59 = vector.broadcast %58 : f32 to vector<1x256xf32>
    %60 = arith.mulf %59, %49 : vector<1x256xf32>
    %61 = arith.addf %47, %60 : vector<1x256xf32>
    %62 = tpu.concatenate %53, %57, %61 in 0 : vector<1x256xf32>, vector<1x256xf32>, vector<1x256xf32> -> vector<3x256xf32>
    %63 = arith.index_cast %arg1 : i32 to index
    %c0_35 = arith.constant 0 : index
    %c0_36 = arith.constant 0 : index
    %64 = vector.load %arg6[%63, %c0_35, %c0_36] : memref<1x3x256xf32, #tpu.memory_space<vmem>>, vector<1x3x256xf32>
    %65 = vector.shape_cast %64 : vector<1x3x256xf32> to vector<3x256xf32>
    %66 = vector.shape_cast %62 : vector<3x256xf32> to vector<1x3x256xf32>
    tpu.vector_store %arg6[%63, %c0_35, %c0_36], %66 {strides = array<i32>} : memref<1x3x256xf32, #tpu.memory_space<vmem>>, vector<1x3x256xf32>,
    %c0_i32 = arith.constant 0 : i32
    %67 = arith.cmpi eq, %arg1, %c0_i32 : i32
    %68 = arith.extui %67 : i1 to i32
    %c0_i32_37 = arith.constant 0 : i32
    %69 = arith.cmpi ne, %68, %c0_i32_37 : i32
    scf.if %69 {
      %cst_49 = arith.constant 0xFF800000 : f32
      %89 = vector.broadcast %cst_49 : f32 to vector<3x1xf32>
      %c0_50 = arith.constant 0 : index
      %c0_51 = arith.constant 0 : index
      %90 = vector.load %arg7[%c0_50, %c0_51] : memref<3x1xf32, #tpu.memory_space<vmem>>, vector<3x1xf32>
      tpu.vector_store %arg7[%c0_50, %c0_51], %89 {strides = array<i32>} : memref<3x1xf32, #tpu.memory_space<vmem>>, vector<3x1xf32>,
      %cst_52 = arith.constant 0.000000e+00 : f32
      %91 = vector.broadcast %cst_52 : f32 to vector<3x1xf32>
      %c0_53 = arith.constant 0 : index
      %c0_54 = arith.constant 0 : index
      %92 = vector.load %arg8[%c0_53, %c0_54] : memref<3x1xf32, #tpu.memory_space<vmem>>, vector<3x1xf32>
      tpu.vector_store %arg8[%c0_53, %c0_54], %91 {strides = array<i32>} : memref<3x1xf32, #tpu.memory_space<vmem>>, vector<3x1xf32>,
    } else {
    }
    %c0_38 = arith.constant 0 : index
    %c0_39 = arith.constant 0 : index
    %70 = vector.load %arg7[%c0_38, %c0_39] : memref<3x1xf32, #tpu.memory_space<vmem>>, vector<3x1xf32>
    %cst = arith.constant dense<0xFF800000> : vector<3xf32>
    %71 = vector.multi_reduction <maximumf>, %62, %cst [1] : vector<3x256xf32> to vector<3xf32>
    %72 = vector.shape_cast %71 : vector<3xf32> to vector<3x1xf32>
    %73 = arith.maximumf %70, %72 : vector<3x1xf32>
    %c0_40 = arith.constant 0 : index
    %c0_41 = arith.constant 0 : index
    %74 = vector.load %arg8[%c0_40, %c0_41] : memref<3x1xf32, #tpu.memory_space<vmem>>, vector<3x1xf32>
    %75 = arith.subf %70, %73 : vector<3x1xf32>
    %76 = math.exp %75 : vector<3x1xf32>
    %77 = arith.mulf %74, %76 : vector<3x1xf32>
    %78 = vector.broadcast %73 : vector<3x1xf32> to vector<3x256xf32>
    %79 = arith.subf %62, %78 : vector<3x256xf32>
    %80 = math.exp %79 : vector<3x256xf32>
    %cst_42 = arith.constant dense<0.000000e+00> : vector<3xf32>
    %81 = vector.multi_reduction <add>, %80, %cst_42 [1] : vector<3x256xf32> to vector<3xf32>
    %82 = vector.shape_cast %81 : vector<3xf32> to vector<3x1xf32>
    %83 = arith.addf %77, %82 : vector<3x1xf32>
    %c0_43 = arith.constant 0 : index
    %c0_44 = arith.constant 0 : index
    %84 = vector.load %arg8[%c0_43, %c0_44] : memref<3x1xf32, #tpu.memory_space<vmem>>, vector<3x1xf32>
    tpu.vector_store %arg8[%c0_43, %c0_44], %83 {strides = array<i32>} : memref<3x1xf32, #tpu.memory_space<vmem>>, vector<3x1xf32>,
    %c0_45 = arith.constant 0 : index
    %c0_46 = arith.constant 0 : index
    %85 = vector.load %arg7[%c0_45, %c0_46] : memref<3x1xf32, #tpu.memory_space<vmem>>, vector<3x1xf32>
    tpu.vector_store %arg7[%c0_45, %c0_46], %73 {strides = array<i32>} : memref<3x1xf32, #tpu.memory_space<vmem>>, vector<3x1xf32>,
    %c0_i32_47 = arith.constant 0 : i32
    %86 = arith.cmpi eq, %arg1, %c0_i32_47 : i32
    %87 = arith.extui %86 : i1 to i32
    %c0_i32_48 = arith.constant 0 : i32
    %88 = arith.cmpi ne, %87, %c0_i32_48 : i32
    scf.if %88 {
      %c0_49 = arith.constant 0 : index
      %c0_50 = arith.constant 0 : index
      %89 = vector.load %arg7[%c0_49, %c0_50] : memref<3x1xf32, #tpu.memory_space<vmem>>, vector<3x1xf32>
      %c0_51 = arith.constant 0 : index
      %c0_52 = arith.constant 0 : index
      %90 = vector.load %arg8[%c0_51, %c0_52] : memref<3x1xf32, #tpu.memory_space<vmem>>, vector<3x1xf32>
      %91 = tpu.reciprocal %90 : vector<3x1xf32> -> vector<3x1xf32>
      %c0_53 = arith.constant 0 : index
      %c0_54 = arith.constant 0 : index
      %c0_55 = arith.constant 0 : index
      %92 = vector.load %arg6[%c0_53, %c0_54, %c0_55] : memref<1x3x256xf32, #tpu.memory_space<vmem>>, vector<1x3x256xf32>
      %93 = vector.shape_cast %92 : vector<1x3x256xf32> to vector<3x256xf32>
      %94 = vector.broadcast %89 : vector<3x1xf32> to vector<3x256xf32>
      %95 = arith.subf %93, %94 : vector<3x256xf32>
      %96 = math.exp %95 : vector<3x256xf32>
      %97 = vector.broadcast %91 : vector<3x1xf32> to vector<3x256xf32>
      %98 = arith.mulf %96, %97 : vector<3x256xf32>
      %c0_56 = arith.constant 0 : index
      %c0_57 = arith.constant 0 : index
      %c0_58 = arith.constant 0 : index
      %c0_59 = arith.constant 0 : index
      %99 = vector.load %arg5[%c0_56, %c0_57, %c0_58, %c0_59] : memref<1x3x1x256xf32, #tpu.memory_space<vmem>>, vector<1x3x1x256xf32>
      %100 = vector.shape_cast %99 : vector<1x3x1x256xf32> to vector<3x256xf32>
      %101 = vector.shape_cast %98 : vector<3x256xf32> to vector<1x3x1x256xf32>
      tpu.vector_store %arg5[%c0_56, %c0_57, %c0_58, %c0_59], %101 {strides = array<i32>} : memref<1x3x1x256xf32, #tpu.memory_space<vmem>>, vector<1x3x1x256xf32>,
    } else {
    }
    return
  }
  func.func @transform_0(%arg0: i32, %arg1: i32) -> (i32, i32, i32) {
    %c0_i32 = arith.constant 0 : i32
    %c0_i32_0 = arith.constant 0 : i32
    return %arg0, %c0_i32, %arg1 : i32, i32, i32
  }
  func.func @transform_1(%arg0: i32, %arg1: i32) -> (i32, i32) {
    %c0_i32 = arith.constant 0 : i32
    %c0_i32_0 = arith.constant 0 : i32
    %c0_i32_1 = arith.constant 0 : i32
    return %c0_i32, %c0_i32_0 : i32, i32
  }
  func.func @transform_2(%arg0: i32, %arg1: i32) -> i32 {
    %c0_i32 = arith.constant 0 : i32
    %c0_i32_0 = arith.constant 0 : i32
    return %c0_i32 : i32
  }
  func.func @transform_3(%arg0: i32, %arg1: i32) -> (i32, i32, i32, i32) {
    %c0_i32 = arith.constant 0 : i32
    %c0_i32_0 = arith.constant 0 : i32
    %c0_i32_1 = arith.constant 0 : i32
    %c0_i32_2 = arith.constant 0 : i32
    return %arg0, %c0_i32, %c0_i32_0, %c0_i32_1 : i32, i32, i32, i32
  }
}

</mosaic_0001>

<bundles_post_ra>
// kernel: tpu_custom_call.1
= control target key start
LH: loop header
LB: loop body
LE: loop exit
PB: predicated region body
PF: predicated region fallthrough
CT: control target
= control target key end

     0   :  { %8 = vsyncpa [#allocation6], 0  ;;  %s1034_s0 = inlined_call_operand.hbm [shape: f32[2,4,256], index: 0, kind: input, shape index: {}]   ;;  %s1035_s1 = inlined_call_operand.hbm [shape: f32[3,4], index: 1, kind: input, shape index: {}]   ;;  %s1036_s2 = inlined_call_operand.vmem [shape: f32[3], index: 2, kind: input, shape index: {}]   ;;  %s1037_s3 = inlined_call_operand.hbm [shape: f32[2,3,1,256], index: 3, kind: output, shape index: {}]  }
   0x1   :  { %10 = vsyncpa [#allocation6 + $0x1], 0 }
   0x2   :  { %11 = vsyncpa [#allocation8], 0 }
   0x3   :  { %12 = vsyncpa [#allocation9], 0 }
   0x4   :  { %13 = vsyncpa [#allocation7], 0 }
   0x5   :  { %15 = vsyncpa [#allocation7 + $0x1], 0  ;;  %s867_s12 = smov 0   ;;  %s869_s13 = smov 0  }
   0x6   :  { %s871_s14 = smov 0   ;;  %s873_s15 = smov 0  }
   0x7   :  { %s875_s16 = smov 0   ;;  %s877_s17 = smov 0  }
   0x8 LB: > { %s551_s18 = sadd.s32 4294967295, %s837_s17   ;;  %s552_s19 = sadd.s32 4294967294, %s837_s17   ;;  %s837_s17 = sphi %s877_s17, %s21_s17   ;;  %s833_s16 = sphi %s875_s16, %s1047_s16   ;;  %s829_s15 = sphi %s873_s15, %s1046_s15   ;;  %s825_s14 = sphi %s871_s14, %s1045_s14   ;;  %s821_s13 = sphi %s869_s13, %s1044_s13   ;;  %s817_s12 = sphi %s867_s12, %s1043_s12  }
   0x9   : > { %p55_p0 = scmp.ne.s32.totalorder %s821_s13, %s817_s12  ;;  %p901_p1 = scmp.eq.s32.totalorder %s551_s18, 0 }
   0xa   : > { %p127_p2 = scmp.eq.s32.totalorder %s552_s19, 1  ;;  %p553_p4 = scmp.ge.s32.totalorder %s837_s17, 1 }
   0xb   : > { %p907_p3 = por %p901_p1, %p55_p0  ;;  %p134_p6 = scmp.lt.s32.totalorder %s837_s17, 3 }
   0xc   : > { %p912_p5 = por %p127_p2, %p55_p0  ;;  %s146_s25 = sshll.u32 %s1035_s1, 4  ;;  %s147_s25 = int_to_ptr.hbm [resolvable:$true] %s146_s25 }
   0xd   : > { %p920_p7 = pnand %p553_p4, %p134_p6  ;;  %p556_p8 = scmp.ge.s32.totalorder %s837_s17, 2 }
   0xe   : > { %s156_s29 = sshll.u32 %s1036_s2, 4  ;;  %s839_s30 = smov [#allocation10]   ;;  %s157_s29 = int_to_ptr.vmem [resolvable:$true] %s156_s29 }
   0xf   : > { %p597_p9 = pneg %p920_p7  ;;  %s840_s4 = smov [#allocation11]  }
  0x10   : > { %p121_p11 = scmp.eq.s32.totalorder %s551_s18, 1  ;;  %s33_s5 = sadd.s32 1, %s833_s16 }
  0x11   : > { %p598_p10 = pnand %p597_p9, %p901_p1  ;;  %p35_p12 = scmp.ge.s32.totalorder %s33_s5, 2 }
  0x12   : > { %s42_s6 = sadd.s32 1, %s825_s14  ;;  %p49_p13 = scmp.ne.s32.totalorder %s825_s14, %s821_s13 }
  0x13   : > { %600 = dma.hbm_to_smem (!%p598_p10), %s147_s25, 64, %s839_s30, [#allocation8]  }
  0x14   : > { %603 = dma.vmem_to_smem (!%p598_p10), %s157_s29, 16, %s840_s4, [#allocation9]  }
  0x15   : > { %p50_p0 = scmp.eq.s32.totalorder %s837_s17, 0  ;;  %s1049_s5 = smov (%p35_p12, %s33_s5), 0 }
  0x16   : > { %p939_p2 = por %p121_p11, %p49_p13  ;;  %p614_p4 = scmp.lt.s32.totalorder %s837_s17, 2 }
  0x17   : > { %s37_s8 = ssub.s32 %s833_s16, %s1049_s5  ;;  %s167_s9 = sand.u32 1, %s825_s14  }
  0x18   : > { %p40_p6 = scmp.eq.s32.totalorder %s37_s8, 0  ;;  %p51_p9 = por %p50_p0, %p49_p13 }
  0x19   : > { %s557_s10 = sshll.u32 %s167_s9, 3  ;;  %s582_s11 = sshll.u32 %s833_s16, 3 }
  0x1a   : > { %s949_s18 = scalar_select %p40_p6, %s825_s14, %s42_s6  }
  0x1b   : > { %s178_s24 = scalar_lea.hbm %s1034_s0, %s582_s11  ;;  %s171_s27 = scalar_lea.vmem [#allocation5], %s557_s10 }
  0x1c   : > { %s180_s25 = sshll.u32 %s178_s24, 4  ;;  %s182_s28 = sshll.u32 %s171_s27, 4  ;;  %s181_s25 = int_to_ptr.hbm [resolvable:$true] %s180_s25  ;;  %s183_s28 = int_to_ptr.vmem [resolvable:$true] %s182_s28 }
  0x1d   : > { %p605_p10 = pnand %p614_p4, %p51_p9  ;;  %s168_s29 = scalar_lea.sflag [#allocation6], %s167_s9 }
  0x1e   : > { %191 = sbr.rel (%p920_p7) target bundleno = 569 (0x239), region = 32  ;;  %s959_s30 = sand.u32 (!%p920_p7), 1, %s821_s13  }
  0x1f   : > { %607 = dma.hbm_to_vmem [thread:$0]  (!%p605_p10), %s181_s25, 128, %s183_s28, %s168_s29  }
  0x20   : > { %s561_s4 = sshll.u32 (!%p920_p7), %s959_s30, 3  ;;  %s194_s6 = scalar_lea.sflag (!%p920_p7), [#allocation6], %s959_s30 }
  0x21   : > { %s963_s8 = scalar_lea.vmem (!%p920_p7), [#allocation5], %s561_s4 }
  0x23   : > { %800 = dma.done.wait (%p907_p3), %s194_s6, 128  }
  0x24   : > { %802 = vsyncadd (%p907_p3), %s194_s6, 4294967168 }
  0x25   : > { %804 = dma.done.wait (%p901_p1), [#allocation8], 64  }
  0x26   : > { %806 = vsyncadd (%p901_p1), [#allocation8], 4294967232 }
  0x27   : > { %808 = dma.done.wait (%p901_p1), [#allocation9], 16  }
  0x28   : > { %810 = vsyncadd (%p901_p1), [#allocation9], 4294967280 }
  0x29   : > { %213 = sfence }
  0x2a   : > { %s233_s26 = sld [smem:[#allocation11]]  ;;  %vm329_vm0 = vcmask 2048   ;;  %v841_v0 = vmov -inf   ;;  %v239_v1 = vld [vmem:[%s963_s8] ss:$4 sm:$0x3] }
  0x2b   : > { %s564_s9 = sld [smem:[#allocation11 + $0x1]]  ;;  %330 = vst.msk [vmem:[#allocation3] sm:$0x7] %vm329_vm0, %v841_v0  ;;  %v568_v7 = vld [vmem:[%s963_s8 + $0x1] ss:$4 sm:$0x3] }
  0x2c   : > { %s977_s10 = sld [smem:[#allocation11 + $0x2]]  ;;  %v572_v17 = vld [vmem:[%s963_s8 + $0x2] ss:$4 sm:$0x3]  ;;  %vm309_vm1 = vcmask 1040384   ;;  %vm312_vm2 = vcmask 1041408  }
  0x2d   : > { %s240_s21 = sld [smem:[#allocation10]]  ;;  %v576_v27 = vld [vmem:[%s963_s8 + $0x3] ss:$4 sm:$0x3]  ;;  %vm333_vm3 = vcmask 1042432   ;;  %vm318_vm4 = vcmask 1043456  }
  0x2e   : > { %s566_s11 = sld [smem:[#allocation10 + $0x80]]  ;;  %v842_v59 = vmov 0   ;;  %v843_v60 = vmov 0.0   ;;  %s583_s8 = smul.u32 6, %s959_s30  ;;  %vm410_vm9 = vcmask 1041409   ;;  %vm413_vm10 = vcmask 1042434  }
  0x2f   : > { %s567_s19 = sld [smem:[#allocation10 + $0x100]]  ;;  %674 = vset.pattern.permute.xlu0 %v842_v59  ;;  %675 = vset.pattern.permute.xlu1 %v842_v59  ;;  %331 = vst.msk [vmem:[#allocation4] sm:$0x7] %vm329_vm0, %v843_v60 }
  0x30   : > { %s569_s23 = sld [smem:[#allocation10 + $0x1]]  ;;  %v234_v2 = vstv %s233_s26  ;;  %676 = vset.pattern.permute.xlu2 %v842_v59  ;;  %s584_s26 = smul.u32 6, %s829_s15 }
  0x31   : > { %s570_s24 = sld [smem:[#allocation10 + $0x81]]  ;;  %v236_v4 = vstv %s564_s9  ;;  %s427_s15 = scalar_lea.sflag [#allocation7], %s959_s30 }
  0x32   : > { %s571_s20 = sld [smem:[#allocation10 + $0x101]]  ;;  %v238_v8 = vstv %s977_s10  ;;  %v332_v61 = vld [vmem:[#allocation3] sm:$0x7] }
  0x33   : > { %v241_v3 = vstv %s240_s21  ;;  %s573_s25 = sld [smem:[#allocation10 + $0x2]]  ;;  %s437_s21 = scalar_lea.hbm %s1037_s3, %s584_s26 }
  0x34   : > { %v242_v5 = vmul.f32 %v241_v3, %v239_v1  ;;  %v245_v6 = vstv %s566_s11  ;;  %s574_s27 = sld [smem:[#allocation10 + $0x82]]  ;;  %s231_s11 = scalar_lea.vmem [#allocation12], %s583_s8 }
  0x35   : > { %v246_v9 = vmul.f32 %v245_v6, %v239_v1  ;;  %v249_v10 = vstv %s567_s19  ;;  %s575_s28 = sld [smem:[#allocation10 + $0x102]]  ;;  %s438_s19 = sshll.u32 %s231_s11, 4  ;;  %s439_s19 = int_to_ptr.vmem [resolvable:$true] %s438_s19 }
  0x36   : > { %v243_v11 = vadd.f32 %v242_v5, %v234_v2  ;;  %v250_v12 = vmul.f32 %v249_v10, %v239_v1  ;;  %v255_v13 = vstv %s569_s23  ;;  %s577_s29 = sld [smem:[#allocation10 + $0x3]]  ;;  %s440_s23 = sshll.u32 %s437_s21, 4  ;;  %s441_s23 = int_to_ptr.hbm [resolvable:$true] %s440_s23 }
  0x37   : > { %v247_v14 = vadd.f32 %v246_v9, %v236_v4  ;;  %v256_v15 = vmul.f32 %v568_v7, %v255_v13  ;;  %v259_v16 = vstv %s570_s24  ;;  %s578_s4 = sld [smem:[#allocation10 + $0x83]]  ;;  %s761_s24 = sshra.s32 %s441_s23, 4  ;;  %s762_s24 = int_to_ptr.hbm [resolvable:$true] %s761_s24 }
  0x38   : > { %v251_v18 = vadd.f32 %v250_v12, %v238_v8  ;;  %v260_v19 = vmul.f32 %v568_v7, %v259_v16  ;;  %v263_v20 = vstv %s571_s20  ;;  %s579_s6 = sld [smem:[#allocation10 + $0x103]]  ;;  %s763_s20 = scalar_lea.hbm %s762_s24, 6 }
  0x39   : > { %v257_v21 = vadd.f32 %v256_v15, %v243_v11  ;;  %v264_v22 = vmul.f32 %v568_v7, %v263_v20  ;;  %v269_v23 = vstv %s573_s25  ;;  %p764_p1 = scmp.ne.s32.totalorder %s762_s24, %s763_s20  ;;  %p768_p11 = scmp.lt.s32.totalorder %s762_s24, %s1037_s3 }
  0x3a   : > { %v261_v24 = vadd.f32 %v260_v19, %v247_v14  ;;  %v270_v25 = vmul.f32 %v572_v17, %v269_v23  ;;  %v273_v26 = vstv %s574_s27  ;;  %v340_v14 = vld [vmem:[#allocation4] sm:$0x7] }
  0x3b   : > { %v265_v28 = vadd.f32 %v264_v22, %v251_v18  ;;  %v274_v29 = vmul.f32 %v572_v17, %v273_v26  ;;  %v277_v30 = vstv %s575_s28  ;;  %p765_p3 = pnand %p764_p1, %p939_p2  ;;  %s767_s28 = scalar_lea.hbm %s1037_s3, 12 }
  0x3c   : > { %v271_v31 = vadd.f32 %v270_v25, %v257_v21  ;;  %v278_v32 = vmul.f32 %v572_v17, %v277_v30  ;;  %v283_v33 = vstv %s577_s29  ;;  %p769_p12 = scmp.lt.s32.totalorder %s767_s28, %s763_s20 }
  0x3d   : > { %v275_v34 = vadd.f32 %v274_v29, %v261_v24  ;;  %v284_v35 = vmul.f32 %v576_v27, %v283_v33  ;;  %v287_v36 = vstv %s578_s4  ;;  %v844_v29 = vmov 839922192   ;;  %p766_p7 = pneg %p765_p3 }
  0x3e   : > { %v279_v37 = vadd.f32 %v278_v32, %v265_v28  ;;  %v288_v38 = vmul.f32 %v576_v27, %v287_v36  ;;  %v291_v39 = vstv %s579_s6  ;;  %v390_v30 = vunpack.c.l.s4 %v844_v29  ;;  %p770_p13 = por %p769_p12, %p768_p11 }
  0x3f   : > { %v285_v40 = vadd.f32 %v284_v35, %v271_v31  ;;  %v292_v41 = vmul.f32 %v576_v27, %v291_v39 }
  0x40   : > { %v289_v42 = vadd.f32 %v288_v38, %v275_v34  ;;  %v391_v31 = vunpack.c.0.s8 %v390_v30  ;;  %v419_v38 = vlaneseq  ;;  %p771_p0 = pnand %p770_p13, %p766_p7 }
  0x41   : > { %v293_v43 = vadd.f32 %v292_v41, %v279_v37  ;;  %v295_v44 = vperm.slane %v285_v40, 0  ;;  %v296_v45 = vperm.slane %v285_v40, 1 }
  0x42   : > { %v300_v46 = vperm.slane %v289_v42, 0  ;;  %v301_v47 = vperm.slane %v289_v42, 1  ;;  %vm421_vm11 = vcmp.lt.s32.totalorder %v419_v38, 256 }
  0x43   : > { %v305_v48 = vperm.slane %v293_v43, 0  ;;  %v306_v49 = vperm.slane %v293_v43, 1 }
  0x44   : > { %v310_v50 = vsel %vm309_vm1, %v295_v44, %v300_v46  ;;  %v311_v51 = vsel %vm309_vm1, %v296_v45, %v301_v47 }
  0x45   : > { %v313_v52 = vsel %vm312_vm2, %v310_v50, %v305_v48  ;;  %v314_v53 = vsel %vm312_vm2, %v311_v51, %v306_v49 }
  0x46   : > { %v317_v54 = vrot.slane %v314_v53, 4  ;;  %v334_v55 = vsel %vm333_vm3, %v313_v52, -inf  ;;  %v335_v56 = vsel %vm333_vm3, %v314_v53, -inf }
  0x47   : > { %v336_v57 = vmax.f32 %v334_v55, %v335_v56 }
  0x48   : > { %v319_v58 = vsel %vm318_vm4, %v313_v52, %v317_v54 }
  0x49   : > { %337 = vmax.xlane.f32.xlu0 %v336_v57  ;;  %324 = vst [vmem:[#allocation2] sm:$0x77] %v319_v58 }
  0x50   : > { %v384_v34 = vld [vmem:[#allocation2] sm:$0x77] }
  0xbc   : > { %v338_v62 = vpop.xlane.xlu0 %337 }
  0xbd   : > { %v339_v63 = vmax.f32 %v332_v61, %v338_v62 }
  0xbf   : > { %v341_v0 = vsub.f32 %v332_v61, %v339_v63  ;;  %364 = vst.msk [vmem:[#allocation3] sm:$0x7] %vm329_vm0, %v339_v63  ;;  %347 = vperm.xlu0 %674, %v339_v63  }
  0xc1   : > { %v342_v12 = vmul.f32 1.442695, %v341_v0 }
  0xc6   : > { %v368_v11 = vld [vmem:[#allocation3] sm:$0x7] }
 0x131   : > { %v348_v1 = vpop.permute.xlu0 %347 }
 0x132   : > { %v350_v2 = vsub.f32 %v313_v52, %v348_v1  ;;  %v351_v3 = vsub.f32 %v314_v53, %v348_v1 }
 0x134   : > { %v352_v4 = vmul.f32 1.442695, %v350_v2  ;;  %v354_v5 = vmul.f32 1.442695, %v351_v3 }
 0x136   : > { %677 = vpow2.f32 %v352_v4 }
 0x137   : > { %679 = vpow2.f32 %v354_v5 }
 0x138   : > { %681 = vpow2.f32 %v342_v12 }
 0x13c   : > { %v678_v6 = vpop.eup %677 }
 0x13d   : > { %v680_v7 = vpop.eup %679  ;;  %v356_v8 = vsel %vm333_vm3, %v678_v6, 0.0 }
 0x13e   : > { %v357_v9 = vsel %vm333_vm3, %v680_v7, 0.0  ;;  %v682_v13 = vpop.eup %681 }
 0x13f   : > { %v358_v10 = vadd.f32 %v357_v9, %v356_v8  ;;  %v344_v15 = vmul.f32 %v682_v13, %v340_v14 }
 0x141   : > { %359 = vadd.xlane.f32.xlu1 %v358_v10 }
 0x15a   : > { %387 = vperm.xlu1 %675, %v368_v11  }
 0x1b4   : > { %v360_v16 = vpop.xlane.xlu1 %359 }
 0x1b5   : > { %v361_v17 = vadd.f32 %v360_v16, %v344_v15 }
 0x1b7   : > { %363 = vst.msk [vmem:[#allocation4] sm:$0x7] %vm329_vm0, %v361_v17 }
 0x1be   : > { %v369_v18 = vld [vmem:[#allocation4] sm:$0x7] }
 0x1bf   : > { %683 = vrcp.f32 %v369_v18  ;;  %v381_v22 = vand.u32 2147483648, %v369_v18  ;;  %v379_v24 = vand.u32 2147483647, %v369_v18  ;;  %vm375_vm6 = vweird.f32 %v369_v18 }
 0x1c1   : > { %v382_v26 = vor.u32 1.1754944e-38, %v381_v22  ;;  %vm380_vm8 = vcmp.eq.f32.partialorder %v379_v24, 8.507059e+37 }
 0x1c5   : > { %v684_v19 = vpop.eup %683 }
 0x1c6   : > { %v371_v20 = vmul.f32 %v684_v19, %v369_v18  ;;  %vm376_vm5 = vweird.f32 %v684_v19 }
 0x1c7   : > { %vm377_vm7 = vmor %vm375_vm6, %vm376_vm5 }
 0x1c8   : > { %v372_v21 = vsub.f32 1.0, %v371_v20 }
 0x1ca   : > { %v373_v23 = vmul.f32 %v684_v19, %v372_v21 }
 0x1cc   : > { %v374_v25 = vadd.f32 %v684_v19, %v373_v23  ;;  %v388_v32 = vpop.permute.xlu1 %387 }
 0x1cd   : > { %v392_v33 = vperm.slane %v388_v32, %v391_v31 }
 0x1ce   : > { %v378_v27 = vsel %vm377_vm7, %v684_v19, %v374_v25 }
 0x1cf   : > { %v383_v28 = vsel %vm380_vm8, %v382_v26, %v378_v27  ;;  %v394_v35 = vsub.f32 %v384_v34, %v392_v33 }
 0x1d0   : > { %399 = vperm.xlu2 %676, %v383_v28  }
 0x1d1   : > { %v395_v36 = vmul.f32 1.442695, %v394_v35 }
 0x1d3   : > { %685 = vpow2.f32 %v395_v36 }
 0x1d9   : > { %v686_v40 = vpop.eup %685 }
 0x22a   : > { %v400_v37 = vpop.permute.xlu2 %399 }
 0x22b   : > { %v404_v39 = vperm.slane %v400_v37, %v391_v31 }
 0x22d   : > { %v406_v41 = vmul.f32 %v686_v40, %v404_v39 }
 0x22f   : > { %v408_v42 = vrot.slane %v406_v41, 3 }
 0x231   : > { %v409_v43 = vsel %vm309_vm1, %v406_v41, %v408_v42  ;;  %v411_v44 = vsel %vm410_vm9, %v406_v41, %v408_v42  ;;  %v414_v45 = vsel %vm413_vm10, %v406_v41, %v408_v42 }
 0x232   : > { %v412_v46 = vrot.slane %v411_v44, 1  ;;  %v415_v47 = vrot.slane %v414_v45, 2  ;;  %423 = vst.msk [vmem:[%s231_s11] sm:$0x3] %vm421_vm11, %v409_v43 }
 0x234   : > { %424 = vst.msk [vmem:[%s231_s11 + $0x2] sm:$0x3] %vm421_vm11, %v412_v46 }
 0x235   : > { %425 = vst.msk [vmem:[%s231_s11 + $0x4] sm:$0x3] %vm421_vm11, %v415_v47 }
 0x236   : > { %774 = shalt.err (!%p771_p0)
}
 0x237   : > { %s845_s30 = smov 32   ;;  %s846_s6 = smov 2  }
 0x238   : > { %595 = dma.vmem_to_hbm [thread:$0]  (%p939_p2), %s439_s19, 96, %s441_s23, %s427_s15, %s845_s30, %s845_s30, %s846_s6  }
 0x239 PF: > { %s455_s8 = sand.u32 1, %s817_s12   ;;  %p609_p4 = pnand %p556_p8, %p912_p5 }
 0x23a   : > { %s456_s26 = scalar_lea.sflag [#allocation7], %s455_s8 }
 0x23b   : > { %p610_p6 = pneg %p609_p4 }
 0x23d   : > { %812 = dma.done.wait (%p610_p6), %s456_s26, 96  }
 0x23e   : > { %814 = vsyncadd (%p610_p6), %s456_s26, 4294967200  ;;  %s21_s17 = sadd.s32 1, %s837_s17   ;;  %s1043_s12 = smov %s821_s13 }
 0x23f   : > { %p18_p9 = scmp.ge.s32.totalorder %s21_s17, 4   ;;  %s1044_s13 = smov %s825_s14 }
 0x240   : > { %s1045_s14 = smov %s949_s18  ;;  %s1046_s15 = smov %s833_s16 }
 0x241   : > { %s1047_s16 = smov %s1049_s5  ;;  %20 = sbr.rel (!%p18_p9) target bundleno = 8 (0x8), region = 99 }
 0x246   :  { %462 = vsyncpa [#allocation6], 1 }
 0x247   :  { %464 = vsyncpa [#allocation6 + $0x1], 1 }
 0x248   :  { %465 = vsyncpa [#allocation7], 1 }
 0x249   :  { %467 = vsyncpa [#allocation7 + $0x1], 1 }
 0x24a   :  { %468 = vsyncpa [#allocation8], 1 }
 0x24b   :  { %470 = vsyncpa [#allocation8 + $0x1], 1 }
 0x24c   :  { %471 = vsyncpa [#allocation9], 1 }
 0x24d   :  { %473 = vsyncpa [#allocation9 + $0x1], 1 }

</bundles_post_ra>
